<compile_context>
chip_gen: v5e
topology: v5e:2x2
jax: 0.10.0
libtpu: 0.0.40
codegen_flags: <defaults>
</compile_context>

<pallas_src>
import functools

import jax
import jax.numpy as jnp
from jax import lax
from jax.experimental import pallas as pl
from jax.experimental.pallas import tpu as pltpu


def _conv_block_kernel(a_ref, s_ref, wa_ref, wb_ref, out_ref, *, d2b, wv):
    """One grid step = TB batch samples merged along the lane axis."""
    # Stage 1: conv_2a + BN(scale,bias folded) + ReLU, one stacked-K matmul.
    # The indicator row in `a` makes halo columns come out exactly 0 (so they
    # act as conv-2b's zero padding) while valid columns get the bias added.
    y = jnp.dot(wa_ref[...], a_ref[0], preferred_element_type=jnp.float32)
    y = jnp.maximum(y, 0.0).astype(jnp.bfloat16)            # (Co, TB*Lp)

    # Stage 2: conv_2b + shortcut conv_1 + both BN biases, one stacked-K matmul.
    # K = 3*Co (dilated taps of y) + Ci (1x1 shortcut input) + 1 (bias row).
    # The tap shifts stay inside each sample's Lp-wide slot (zero halo inside).
    stack = jnp.concatenate(
        [y[:, 0:wv],
         y[:, d2b:d2b + wv],
         y[:, 2 * d2b:2 * d2b + wv],
         s_ref[0][:, 0:wv]],
        axis=0)                                             # (3*Co+Ci+1, wv)
    z = jnp.dot(wb_ref[...], stack, preferred_element_type=jnp.float32)
    out_ref[0] = jnp.maximum(z, 0.0)                        # residual add + ReLU


def _fold_bn(gamma, beta, mean, var, eps):
    scale = gamma / jnp.sqrt(var + eps)
    bias = beta - mean * scale
    return scale.astype(jnp.float32), bias.astype(jnp.float32)


def conv_block_forward(x, params, *, stride, dilation, eps=1e-5,
                       vmem_budget_bytes=12 * 1024 * 1024):
    x = x.astype(jnp.float32)
    n, ci, length = x.shape
    co = params["w2a"].shape[0]
    d2a, d2b = dilation

    # PyTorch Conv1d output-length arithmetic.
    l2a = (length + 2 * 1 - d2a * 2 - 1) // stride + 1
    l2b = (l2a + 2 * 2 - d2b * 2 - 1) // 1 + 1
    l_out = (length - 1) // stride + 1
    assert l2b == l_out, "branch lengths must match for the residual add"
    lp = l2a + 4                         # per-sample slot width (conv-2b padded y)
    assert lp - l_out == 2 * d2b

    # ---- fold BatchNorm (inference) into weights / biases --------------------
    s2a, b2a = _fold_bn(params["g2a"], params["b2a"], params["m2a"], params["v2a"], eps)
    s2b, b2b = _fold_bn(params["g2b"], params["b2b"], params["m2b"], params["v2b"], eps)
    s1, b1 = _fold_bn(params["g1"], params["b1"], params["m1"], params["v1"], eps)

    w2a_f = params["w2a"].astype(jnp.float32) * s2a[:, None, None]   # (Co, Ci, 3)
    w2b_f = params["w2b"].astype(jnp.float32) * s2b[:, None, None]   # (Co, Co, 3)
    w1_f = params["w1"][:, :, 0].astype(jnp.float32) * s1[:, None]   # (Co, Ci)

    # Stacked-K weights, biases appended as an extra contraction column (bf16 MXU).
    wa = jnp.concatenate([w2a_f[:, :, 0], w2a_f[:, :, 1], w2a_f[:, :, 2],
                          b2a[:, None]], axis=1).astype(jnp.bfloat16)         # (Co, 3Ci+1)
    wb = jnp.concatenate([w2b_f[:, :, 0], w2b_f[:, :, 1], w2b_f[:, :, 2],
                          w1_f, (b2b + b1)[:, None]], axis=1).astype(jnp.bfloat16)  # (Co, 3Co+Ci+1)

    # ---- im2col-lite in XLA: shift / stride-decimate / stack taps ------------
    xpad = jnp.pad(x, ((0, 0), (0, 0), (1, 1)))                       # (N, Ci, L+2)
    taps = [lax.slice(xpad, (0, 0, k * d2a),
                      (n, ci, k * d2a + stride * (l2a - 1) + 1),
                      (1, 1, stride)) for k in range(3)]
    a_core = jnp.concatenate(taps + [jnp.ones((n, 1, l2a), jnp.float32)], axis=1)
    a_full = jnp.pad(a_core, ((0, 0), (0, 0), (2, 2)))                # (N, 3Ci+1, Lp)

    x_str = lax.slice(x, (0, 0, 0), (n, ci, stride * (l_out - 1) + 1), (1, 1, stride))
    s_core = jnp.concatenate([x_str, jnp.ones((n, 1, l_out), jnp.float32)], axis=1)
    s_full = jnp.pad(s_core, ((0, 0), (0, 0), (0, lp - l_out)))       # (N, Ci+1, Lp)

    # ---- samples per grid step: fill VMEM, amortize per-step overhead --------
    bytes_in = lp * ((3 * ci + 1) + (ci + 1)) * 2                     # bf16 inputs / col
    bytes_out = lp * co * 4
    bytes_live = lp * (co * 4 + co * 2 + (3 * co + ci + 1) * 2 + co * 4)
    per_sample = 2 * bytes_in + 2 * bytes_out + bytes_live            # 2x = double buffer
    tb = max(1, min(n, vmem_budget_bytes // max(per_sample, 1)))
    num_chunks = -(-n // tb)
    n_pad = num_chunks * tb
    if n_pad != n:
        a_full = jnp.pad(a_full, ((0, n_pad - n), (0, 0), (0, 0)))
        s_full = jnp.pad(s_full, ((0, n_pad - n), (0, 0), (0, 0)))

    wm = tb * lp                      # merged lane width per grid step
    wv = wm - 2 * d2b                 # width needed after the widest tap shift

    a_m = a_full.reshape(num_chunks, tb, 3 * ci + 1, lp).transpose(0, 2, 1, 3) \
                .reshape(num_chunks, 3 * ci + 1, wm).astype(jnp.bfloat16)
    s_m = s_full.reshape(num_chunks, tb, ci + 1, lp).transpose(0, 2, 1, 3) \
                .reshape(num_chunks, ci + 1, wm).astype(jnp.bfloat16)

    kernel = functools.partial(_conv_block_kernel, d2b=d2b, wv=wv)

    flops = 2 * num_chunks * (co * (3 * ci + 1) * wm + co * (3 * co + ci + 1) * wv)
    bytes_accessed = (a_m.size + s_m.size + wa.size + wb.size) * 2 \
        + num_chunks * co * wv * 4

    out = pl.pallas_call(
        kernel,
        out_shape=jax.ShapeDtypeStruct((num_chunks, co, wv), jnp.float32),
        grid=(num_chunks,),
        in_specs=[
            pl.BlockSpec((1, 3 * ci + 1, wm), lambda i: (i, 0, 0)),
            pl.BlockSpec((1, ci + 1, wm), lambda i: (i, 0, 0)),
            pl.BlockSpec((co, 3 * ci + 1), lambda i: (0, 0)),
            pl.BlockSpec((co, 3 * co + ci + 1), lambda i: (0, 0)),
        ],
        out_specs=pl.BlockSpec((1, co, wv), lambda i: (i, 0, 0)),
        compiler_params=pltpu.CompilerParams(
            dimension_semantics=("parallel",),
            vmem_limit_bytes=48 * 1024 * 1024),
        cost_estimate=pl.CostEstimate(flops=flops, transcendentals=0,
                                      bytes_accessed=bytes_accessed),
    )(a_m, s_m, wa, wb)

    # ---- un-merge lanes back to (N, Co, l_out): pure XLA glue -----------------
    out = jnp.pad(out, ((0, 0), (0, 0), (0, 2 * d2b)))                # back to TB*Lp
    out = out.reshape(num_chunks, co, tb, lp)[:, :, :, :l_out]
    out = out.transpose(0, 2, 1, 3).reshape(n_pad, co, l_out)
    return out[:n]


def _ref_forward(x, p, *, stride, dilation, eps=1e-5):
    """Pure-JAX f32 reference (lax.conv_general_dilated) for correctness check."""
    def conv1d(inp, w, st, pad, dil):
        return jax.lax.conv_general_dilated(
            inp, w, window_strides=(st,), padding=[(pad, pad)],
            rhs_dilation=(dil,), dimension_numbers=("NCH", "OIH", "NCH"))

    def bn(inp, g, b, m, v):
        return ((inp - m[None, :, None]) / jnp.sqrt(v[None, :, None] + eps)
                * g[None, :, None] + b[None, :, None])

    y = jax.nn.relu(bn(conv1d(x, p["w2a"], stride, 1, dilation[0]),
                       p["g2a"], p["b2a"], p["m2a"], p["v2a"]))
    y = bn(conv1d(y, p["w2b"], 1, 2, dilation[1]),
           p["g2b"], p["b2b"], p["m2b"], p["v2b"])
    ident = bn(conv1d(x, p["w1"], stride, 0, 1),
               p["g1"], p["b1"], p["m1"], p["v1"])
    return jax.nn.relu(y + ident)


def _init_params(key, in_channels, out_channels):
    ks = jax.random.split(key, 8)
    p = {
        "w2a": 0.1 * jax.random.normal(ks[0], (out_channels, in_channels, 3), jnp.float32),
        "w2b": 0.1 * jax.random.normal(ks[1], (out_channels, out_channels, 3), jnp.float32),
        "w1":  0.1 * jax.random.normal(ks[2], (out_channels, in_channels, 1), jnp.float32),
    }
    for name, kk in zip(("2a", "2b", "1"), (ks[3], ks[4], ks[5])):
        k1, k2, k3, k4 = jax.random.split(kk, 4)
        p["g" + name] = 1.0 + 0.1 * jax.random.normal(k1, (out_channels,), jnp.float32)
        p["b" + name] = 0.1 * jax.random.normal(k2, (out_channels,), jnp.float32)
        p["m" + name] = 0.1 * jax.random.normal(k3, (out_channels,), jnp.float32)
        p["v" + name] = 0.5 + jax.random.uniform(k4, (out_channels,), jnp.float32)
    return p


if __name__ == "__main__":
    key = jax.random.PRNGKey(0)
    k_x, k_p = jax.random.split(key)

    batch, in_channels, out_channels, length = 2, 4, 8, 16
    stride, dilation = 1, (1, 2)   # dilation[1]=2 keeps residual lengths equal

    x = jax.random.normal(k_x, (batch, in_channels, length), jnp.float32)
    params = _init_params(k_p, in_channels, out_channels)

    out = conv_block_forward(x, params, stride=stride, dilation=dilation)
    out = jax.block_until_ready(out)

    ref = _ref_forward(x, params, stride=stride, dilation=dilation)
    assert out.shape == ref.shape
    # bf16 MXU inputs, f32 accumulation/epilogue -> loose-ish tolerance.
    assert jnp.allclose(out, ref, atol=5e-2, rtol=5e-2), "mismatch vs JAX reference"

    print("KERNEL_OK")
</pallas_src>

<mosaic_0001>
module attributes {stable_mosaic.version = 11 : i64} {
  func.func @_conv_block_kernel(%arg0: i32, %arg1: memref<1x13x40xbf16, #tpu.memory_space<vmem>>, %arg2: memref<1x5x40xbf16, #tpu.memory_space<vmem>>, %arg3: memref<8x13xbf16, #tpu.memory_space<vmem>>, %arg4: memref<8x29xbf16, #tpu.memory_space<vmem>>, %arg5: memref<1x8x36xf32, #tpu.memory_space<vmem>>) attributes {dimension_semantics = [#tpu.dimension_semantics<parallel>], iteration_bounds = array<i64: 1>, scalar_prefetch = 0 : i64, scratch_operands = 0 : i64, tpu.core_type = #tpu.core_type<tc>, window_params = [{transform_indices = @transform_0, window_bounds = array<i64: 1, 13, 40>}, {transform_indices = @transform_1, window_bounds = array<i64: 1, 5, 40>}, {pipeline_mode = #tpu.pipeline_mode<synchronous>, transform_indices = @transform_2, window_bounds = array<i64: 8, 13>}, {pipeline_mode = #tpu.pipeline_mode<synchronous>, transform_indices = @transform_3, window_bounds = array<i64: 8, 29>}, {transform_indices = @transform_4, window_bounds = array<i64: 1, 8, 36>}]} {
    %c0 = arith.constant 0 : index
    %c0_0 = arith.constant 0 : index
    %0 = vector.load %arg3[%c0, %c0_0] : memref<8x13xbf16, #tpu.memory_space<vmem>>, vector<8x13xbf16>
    %c0_1 = arith.constant 0 : index
    %c0_2 = arith.constant 0 : index
    %c0_3 = arith.constant 0 : index
    %1 = vector.load %arg1[%c0_1, %c0_2, %c0_3] : memref<1x13x40xbf16, #tpu.memory_space<vmem>>, vector<1x13x40xbf16>
    %2 = vector.shape_cast %1 : vector<1x13x40xbf16> to vector<13x40xbf16>
    %cst = arith.constant dense<0.000000e+00> : vector<8x40xf32>
    %3 = tpu.matmul %0, %2, %cst {dimension_numbers = #tpu.dot_dimension_numbers<[1], [0], [0], [1], [0, 0, 1, 1], [], []>} : vector<8x13xbf16>, vector<13x40xbf16>, vector<8x40xf32> -> vector<8x40xf32>
    %cst_4 = arith.constant 0.000000e+00 : f32
    %4 = vector.broadcast %cst_4 : f32 to vector<8x40xf32>
    %5 = arith.maximumf %3, %4 : vector<8x40xf32>
    %6 = arith.truncf %5 : vector<8x40xf32> to vector<8x40xbf16>
    %7 = vector.extract_strided_slice %6 {offsets = [0, 0], sizes = [8, 36], strides = [1, 1]} : vector<8x40xbf16> to vector<8x36xbf16>
    %8 = vector.extract_strided_slice %6 {offsets = [0, 2], sizes = [8, 36], strides = [1, 1]} : vector<8x40xbf16> to vector<8x36xbf16>
    %9 = vector.extract_strided_slice %6 {offsets = [0, 4], sizes = [8, 36], strides = [1, 1]} : vector<8x40xbf16> to vector<8x36xbf16>
    %c0_5 = arith.constant 0 : index
    %c0_6 = arith.constant 0 : index
    %c0_7 = arith.constant 0 : index
    %10 = vector.load %arg2[%c0_5, %c0_6, %c0_7] : memref<1x5x40xbf16, #tpu.memory_space<vmem>>, vector<1x5x40xbf16>
    %11 = vector.shape_cast %10 : vector<1x5x40xbf16> to vector<5x40xbf16>
    %12 = vector.extract_strided_slice %11 {offsets = [0, 0], sizes = [5, 36], strides = [1, 1]} : vector<5x40xbf16> to vector<5x36xbf16>
    %13 = tpu.concatenate %7, %8, %9, %12 in 0 : vector<8x36xbf16>, vector<8x36xbf16>, vector<8x36xbf16>, vector<5x36xbf16> -> vector<29x36xbf16>
    %c0_8 = arith.constant 0 : index
    %c0_9 = arith.constant 0 : index
    %14 = vector.load %arg4[%c0_8, %c0_9] : memref<8x29xbf16, #tpu.memory_space<vmem>>, vector<8x29xbf16>
    %cst_10 = arith.constant dense<0.000000e+00> : vector<8x36xf32>
    %15 = tpu.matmul %14, %13, %cst_10 {dimension_numbers = #tpu.dot_dimension_numbers<[1], [0], [0], [1], [0, 0, 1, 1], [], []>} : vector<8x29xbf16>, vector<29x36xbf16>, vector<8x36xf32> -> vector<8x36xf32>
    %cst_11 = arith.constant 0.000000e+00 : f32
    %16 = vector.broadcast %cst_11 : f32 to vector<8x36xf32>
    %17 = arith.maximumf %15, %16 : vector<8x36xf32>
    %c0_12 = arith.constant 0 : index
    %c0_13 = arith.constant 0 : index
    %c0_14 = arith.constant 0 : index
    %18 = vector.load %arg5[%c0_12, %c0_13, %c0_14] : memref<1x8x36xf32, #tpu.memory_space<vmem>>, vector<1x8x36xf32>
    %19 = vector.shape_cast %18 : vector<1x8x36xf32> to vector<8x36xf32>
    %20 = vector.shape_cast %17 : vector<8x36xf32> to vector<1x8x36xf32>
    tpu.vector_store %arg5[%c0_12, %c0_13, %c0_14], %20 {strides = array<i32>} : memref<1x8x36xf32, #tpu.memory_space<vmem>>, vector<1x8x36xf32>,
    return
  }
  func.func @transform_0(%arg0: i32) -> (i32, i32, i32) {
    %c0_i32 = arith.constant 0 : i32
    %c0_i32_0 = arith.constant 0 : i32
    %c0_i32_1 = arith.constant 0 : i32
    return %arg0, %c0_i32, %c0_i32_0 : i32, i32, i32
  }
  func.func @transform_1(%arg0: i32) -> (i32, i32, i32) {
    %c0_i32 = arith.constant 0 : i32
    %c0_i32_0 = arith.constant 0 : i32
    %c0_i32_1 = arith.constant 0 : i32
    return %arg0, %c0_i32, %c0_i32_0 : i32, i32, i32
  }
  func.func @transform_2(%arg0: i32) -> (i32, i32) {
    %c0_i32 = arith.constant 0 : i32
    %c0_i32_0 = arith.constant 0 : i32
    %c0_i32_1 = arith.constant 0 : i32
    return %c0_i32, %c0_i32_0 : i32, i32
  }
  func.func @transform_3(%arg0: i32) -> (i32, i32) {
    %c0_i32 = arith.constant 0 : i32
    %c0_i32_0 = arith.constant 0 : i32
    %c0_i32_1 = arith.constant 0 : i32
    return %c0_i32, %c0_i32_0 : i32, i32
  }
  func.func @transform_4(%arg0: i32) -> (i32, i32, i32) {
    %c0_i32 = arith.constant 0 : i32
    %c0_i32_0 = arith.constant 0 : i32
    %c0_i32_1 = arith.constant 0 : i32
    return %arg0, %c0_i32, %c0_i32_0 : i32, i32, i32
  }
}

</mosaic_0001>

<bundles_post_ra>
// kernel: tpu_custom_call.1
= control target key start
LH: loop header
LB: loop body
LE: loop exit
PB: predicated region body
PF: predicated region fallthrough
CT: control target
= control target key end

     0   :  { %9 = vsyncpa [#allocation3], 0  ;;  %s366_s0 = inlined_call_operand.hbm [shape: bf16[1,13,40], index: 0, kind: input, shape index: {}]   ;;  %s367_s1 = inlined_call_operand.hbm [shape: bf16[1,5,40], index: 1, kind: input, shape index: {}]   ;;  %s368_s2 = inlined_call_operand.hbm [shape: bf16[8,13], index: 2, kind: input, shape index: {}]   ;;  %s369_s3 = inlined_call_operand.hbm [shape: bf16[8,29], index: 3, kind: input, shape index: {}]   ;;  %s370_s4 = inlined_call_operand.hbm [shape: f32[1,8,36], index: 4, kind: output, shape index: {}]  }
   0x1   :  { %10 = vsyncpa [#allocation6], 0 }
   0x2   :  { %11 = vsyncpa [#allocation9], 0  ;;  %s31_s17 = sshll.u32 %s367_s1, 4  ;;  %s32_s17 = int_to_ptr.hbm [resolvable:$true] %s31_s17 }
   0x3   :  { %12 = vsyncpa [#allocation4], 0  ;;  %s316_s18 = smov [#allocation5]   ;;  %s17_s22 = sshll.u32 %s366_s0, 4  ;;  %s18_s22 = int_to_ptr.hbm [resolvable:$true] %s17_s22 }
   0x4   :  { %s33_s19 = sshll.u32 %s316_s18, 4  ;;  %s317_s23 = smov [#allocation2]   ;;  %s34_s19 = int_to_ptr.vmem [resolvable:$true] %s33_s19 }
   0x5   :  { %36 = dma.hbm_to_vmem [thread:$0]  %s32_s17, 64, %s34_s19, [#allocation6]  }
   0x6   :  { %s19_s24 = sshll.u32 %s317_s23, 4  ;;  %s318_s25 = smov 64   ;;  %s20_s24 = int_to_ptr.vmem [resolvable:$true] %s19_s24 }
   0x7   :  { %s319_s26 = smov 4   ;;  %s42_s1 = sshll.u32 %s368_s2, 4  ;;  %s43_s1 = int_to_ptr.hbm [resolvable:$true] %s42_s1 }
   0x8   :  { %25 = dma.hbm_to_vmem [thread:$0]  %s18_s22, 128, %s20_s24, [#allocation3], %s318_s25, %s318_s25, %s319_s26  }
   0x9   :  { %s320_s29 = smov [#allocation7]   ;;  %s53_s0 = sshll.u32 %s369_s3, 4  ;;  %s54_s0 = int_to_ptr.hbm [resolvable:$true] %s53_s0 }
   0xa   :  { %s44_s30 = sshll.u32 %s320_s29, 4  ;;  %s321_s7 = smov [#allocation8]   ;;  %s45_s30 = int_to_ptr.vmem [resolvable:$true] %s44_s30 }
   0xb   :  { %47 = dma.hbm_to_vmem [thread:$0]  %s43_s1, 64, %s45_s30, [#allocation6]  }
   0xc   :  { %s55_s8 = sshll.u32 %s321_s7, 4  ;;  %s56_s8 = int_to_ptr.vmem [resolvable:$true] %s55_s8 }
   0xd   :  { %58 = dma.hbm_to_vmem [thread:$0]  %s54_s0, 64, %s56_s8, [#allocation9]  }
   0xe   :  { %308 = dma.done.wait [#allocation3], 128  }
   0xf   :  { %309 = vsyncadd [#allocation3], 4294967168 }
  0x10   :  { %310 = dma.done.wait [#allocation6], 128  }
  0x11   :  { %311 = vsyncadd [#allocation6], 4294967168 }
  0x12   :  { %312 = dma.done.wait [#allocation9], 64  }
  0x13   :  { %313 = vsyncadd [#allocation9], 4294967232  ;;  %vm88_vm0 = vcmask 1045504   ;;  %vm89_vm1 = vcmask 1046528   ;;  %v322_v0 = vmov 65535   ;;  %vm84_vm2 = vcmask 105472  }
  0x14   :  { %v90_v1 = vsel %vm88_vm0, 4294967295, %v322_v0  ;;  %v173_v2 = vld [vmem:[#allocation2] sm:$0xf]  ;;  %v177_v3 = vld [vmem:[#allocation2] sm:$0x70]  ;;  %s323_s2 = smov 124  }
  0x15   :  { %v91_v4 = vsel %vm89_vm1, %v90_v1, 0  ;;  %v174_v5 = vor.u32 %v177_v3, %v173_v2  ;;  %v76_v7 = vld [vmem:[#allocation7] sm:$0xf]  ;;  %s324_s3 = smov 126   ;;  %v110_v14 = vld [vmem:[#allocation5] sm:$0x7] }
  0x16   :  { %v119_v15 = vunpack.c.l.b16 %v110_v14  ;;  %vm121_vm3 = vcmask 1043456   ;;  %v129_v22 = vld [vmem:[#allocation8] sm:$0xf]  ;;  %vm130_vm4 = vcmask 236544   ;;  %s325_s9 = smov [#allocation10]   ;;  %s159_s13 = sshll.u32 %s370_s4, 4  ;;  %s160_s13 = int_to_ptr.hbm [resolvable:$true] %s159_s13 }
  0x17   :  { %v93_v6 = vand.u32 %v174_v5, %v91_v4  ;;  %s157_s10 = sshll.u32 %s325_s9, 4  ;;  %vm150_vm5 = vcmask 293888   ;;  %s158_s10 = int_to_ptr.vmem [resolvable:$true] %s157_s10 }
  0x18   :  { %v120_v16 = vpack.c.b16 %v119_v15, %v119_v15 }
  0x19   :  { %102 = vmatpush.bf16.msra.mxu0 %v93_v6 }
  0x1c   :  { %175 = vmatmul.msk.bf16.vlgmr.msra.gmra.mxu0 %vm84_vm2, %v76_v7 }
  0x99   :  { %v104_v8 = vpop.f32.mrf.mxu0 }
  0x9a   :  { %v108_v9 = vmax.f32 %v104_v8, 0.0 }
  0x9c   :  { %v109_v10 = vpack.c.bf16 %v108_v9, %v108_v9 }
  0x9e   :  { %v112_v11 = vunpack.c.l.b16 %v109_v10 }
  0xa0   :  { %v113_v12 = vpack.c.b16 %v112_v11, %v112_v11 }
  0xa1   :  { %v106_v13 = vpop.f32.mrf.mxu0 }
  0xa2   :  { %116 = vrot.lane.b32.xlu0 %v113_v12, %s323_s2 }
  0xaa   :  { %114 = vrot.lane.b32.xlu0 %v113_v12, %s324_s3 }
 0x114   :  { %v117_v17 = vpop.permute.xlu0 %116 }
 0x115   :  { %v128_v18 = vsel %vm121_vm3, %v117_v17, %v120_v16 }
 0x116   :  { %v134_v19 = vand.u32 %v128_v18, %v91_v4 }
 0x118   :  { %142 = vmatpush.bf16.msra.mxu1 %v134_v19 }
 0x11c   :  { %v115_v20 = vpop.permute.xlu0 %114 }
 0x11d   :  { %v124_v21 = vsel %vm121_vm3, %v109_v10, %v115_v20 }
 0x11e   :  { %143 = vmatpush.bf16.msra.mxu1 %v124_v21 }
 0x121   :  { %176 = vmatmul.msk.bf16.vlgmr.msra.gmra.mxu1 %vm130_vm4, %v129_v22 }
 0x19e   :  { %v145_v23 = vpop.f32.mrf.mxu1 }
 0x19f   :  { %v149_v24 = vmax.f32 %v145_v23, 0.0 }
 0x1a1   :  { %151 = vst.msk [vmem:[#allocation10] sm:$0xff] %vm150_vm5, %v149_v24 }
 0x1a2   :  { %162 = dma.vmem_to_hbm [thread:$0]  %s158_s10, 128, %s160_s13, [#allocation4]  }
 0x1a6   :  { %v147_v25 = vpop.f32.mrf.mxu1 }
 0x1a7   :  { %314 = dma.done.wait [#allocation4], 128  }
 0x1a8   :  { %315 = vsyncadd [#allocation4], 4294967168 }
 0x1a9   :  { %167 = vsyncpa [#allocation3], 1 }
 0x1aa   :  { %168 = vsyncpa [#allocation6], 1 }
 0x1ab   :  { %169 = vsyncpa [#allocation9], 1 }
 0x1ac   :  { %170 = vsyncpa [#allocation4], 1 }

</bundles_post_ra>
